<compile_context>
chip_gen: v7x
topology: tpu7x:2x2x1
jax: 0.10.0
libtpu: 0.0.40
codegen_flags: <defaults>
</compile_context>

<pallas_src>
import math

import jax
import jax.numpy as jnp
from jax import lax
from jax.experimental import pallas as pl
from jax.experimental.pallas import tpu as pltpu


# ----------------------------------------------------------------------------
# Gaussian taps (static Python floats) + OIHW weight for the reference conv.
# ----------------------------------------------------------------------------
def _normalize(param, dim):
    if isinstance(param, (int, float)):
        return [param] * dim
    return list(param)


def _tap_1d(size, std, t):
    # Reproduce the PyTorch per-dimension factor exactly (note the quirky
    # /(2*std) inside the square).
    mean = (size - 1) / 2.0
    return (1.0 / (std * math.sqrt(2.0 * math.pi))) * math.exp(
        -(((t - mean) / (2.0 * std)) ** 2)
    )


def make_separable_taps(kernel_size, sigma, dim=2):
    """Row/col 1D taps whose outer product equals the module's normalized 2D kernel.

    kernel2d[i][j] = fh(i)*fw(j) / (sum_i fh(i) * sum_j fw(j))
                   = (fh(i)/sum fh) * (fw(j)/sum fw)      -> exactly separable.
    """
    assert dim == 2, "Pallas kernel implements the dim=2 (spatial) case."
    ks = [int(k) for k in _normalize(kernel_size, dim)]
    sg = [float(s) for s in _normalize(sigma, dim)]
    kh, kw = ks
    sh, sw = sg
    th = [_tap_1d(kh, sh, i) for i in range(kh)]
    tw = [_tap_1d(kw, sw, j) for j in range(kw)]
    sh_sum = sum(th)
    sw_sum = sum(tw)
    return [v / sh_sum for v in th], [v / sw_sum for v in tw]


def make_gaussian_weight(channels, kernel_size, sigma, dim=2, dtype=jnp.float32):
    """Depthwise OIHW weight (C, 1, Kh, Kw) built from the same taps (for the reference)."""
    th, tw = make_separable_taps(kernel_size, sigma, dim)
    taps2d = [[a * b for b in tw] for a in th]
    k = jnp.asarray(taps2d, dtype=dtype)[None, None]
    return jnp.tile(k, (channels, 1, 1, 1))


# ----------------------------------------------------------------------------
# Pallas kernel
# ----------------------------------------------------------------------------
def _make_smoothing_kernel(taps_h, taps_w, Ho, Wo):
    Kh = len(taps_h)
    Kw = len(taps_w)

    def kernel(x_ref, o_ref):
        # x_ref: (B, H, W) block of fused (n, c) images; o_ref: (B, Ho, Wo).
        x = x_ref[...].astype(jnp.float32)  # single load + hoisted cast

        # Separable, fully unrolled shift-and-accumulate on the VPU with
        # scalar-constant taps (no broadcasts from a weight ref).
        # Vertical (sublane) pass: (B, H, W) -> (B, Ho, W)
        t = taps_h[0] * x[:, 0:Ho, :]
        for ki in range(1, Kh):
            t = t + taps_h[ki] * x[:, ki : ki + Ho, :]

        # Horizontal (lane) pass: (B, Ho, W) -> (B, Ho, Wo)
        acc = taps_w[0] * t[:, :, 0:Wo]
        for kj in range(1, Kw):
            acc = acc + taps_w[kj] * t[:, :, kj : kj + Wo]

        o_ref[...] = acc.astype(o_ref.dtype)

    return kernel


def _choose_images_per_block(nc, bytes_per_image, vmem_budget):
    """Largest divisor of nc that keeps >=2 grid steps and fits the budget."""
    best = 1
    for b in range(1, nc + 1):
        if nc % b != 0:
            continue
        if nc >= 2 and nc // b < 2:
            # Keep at least 2 grid iterations: feeds both v7x TensorCores and
            # keeps the auto-pipeline non-degenerate.
            continue
        if 2 * b * bytes_per_image > vmem_budget:  # double-buffered in/out
            continue
        best = b
    return best


def gaussian_smoothing(x, kernel_size, sigma, dim=2, *, vmem_block_budget=8 << 20):
    """Depthwise 'valid' Gaussian conv2d (groups = channels). NCHW in/out."""
    N, C, H, W = x.shape
    taps_h, taps_w = make_separable_taps(kernel_size, sigma, dim)
    Kh, Kw = len(taps_h), len(taps_w)
    Ho, Wo = H - Kh + 1, W - Kw + 1
    NC = N * C

    # Free view: NCHW row-major -> (N*C, H, W). Each fused image is an
    # independent depthwise-conv problem.
    x_flat = x.reshape(NC, H, W)

    itemsize = jnp.dtype(x.dtype).itemsize
    # input tile + output tile (double-buffered) + f32 intermediate of the
    # vertical pass (lives in vregs / compiler scratch).
    bytes_per_image = (H * W + Ho * Wo) * itemsize + Ho * W * 4
    B = _choose_images_per_block(NC, bytes_per_image, vmem_block_budget)
    G = NC // B

    kernel = _make_smoothing_kernel(taps_h, taps_w, Ho, Wo)

    # Pure HBM-bandwidth problem: separable conv is ~2*(Kh + Kw) flops / output.
    flops = 2 * NC * (Kh * Ho * W + Kw * Ho * Wo)
    bytes_accessed = (NC * H * W + NC * Ho * Wo) * itemsize

    # TODO(synk): for large-C workloads, a channels-last (H, W, N*C) layout with
    # C padded to a multiple of 128 would make every store lane-dense; at the
    # small C used here that padding would inflate HBM traffic, so NCHW is kept.
    out_flat = pl.pallas_call(
        kernel,
        out_shape=jax.ShapeDtypeStruct((NC, Ho, Wo), x.dtype),
        grid_spec=pltpu.PrefetchScalarGridSpec(
            num_scalar_prefetch=0,
            grid=(G,),
            in_specs=[pl.BlockSpec((B, H, W), lambda g: (g, 0, 0))],
            out_specs=pl.BlockSpec((B, Ho, Wo), lambda g: (g, 0, 0)),
        ),
        compiler_params=pltpu.CompilerParams(
            dimension_semantics=("parallel",),
        ),
        cost_estimate=pl.CostEstimate(
            flops=flops, transcendentals=0, bytes_accessed=bytes_accessed
        ),
    )(x_flat)

    return out_flat.reshape(N, C, Ho, Wo)


# ----------------------------------------------------------------------------
# Pure-JAX reference
# ----------------------------------------------------------------------------
def gaussian_smoothing_ref(x, weight):
    """Depthwise conv2d, valid padding (matches F.conv2d(..., groups=C))."""
    C = x.shape[1]
    return lax.conv_general_dilated(
        x,
        weight.astype(x.dtype),
        window_strides=(1, 1),
        padding="VALID",
        dimension_numbers=("NCHW", "OIHW", "NCHW"),
        feature_group_count=C,
    )


if __name__ == "__main__":
    channels = 4
    kernel_size = 3
    sigma = 0.5

    key = jax.random.PRNGKey(0)
    x = jax.random.normal(key, (2, channels, 16, 16), dtype=jnp.float32)

    out = gaussian_smoothing(x, kernel_size, sigma)
    out = jax.block_until_ready(out)

    weight = make_gaussian_weight(channels, kernel_size, sigma, dim=2)
    ref = gaussian_smoothing_ref(x, weight)
    assert out.shape == ref.shape == (2, channels, 14, 14)
    assert jnp.allclose(out, ref, atol=1e-5, rtol=1e-5)

    print("KERNEL_OK")
</pallas_src>

<mosaic_0001>
module attributes {stable_mosaic.version = 11 : i64} {
  func.func @kernel(%arg0: i32, %arg1: memref<4x16x16xf32, #tpu.memory_space<vmem>>, %arg2: memref<4x14x14xf32, #tpu.memory_space<vmem>>) attributes {dimension_semantics = [#tpu.dimension_semantics<parallel>], iteration_bounds = array<i64: 2>, scalar_prefetch = 0 : i64, scratch_operands = 0 : i64, tpu.core_type = #tpu.core_type<tc>, window_params = [{transform_indices = @transform_0, window_bounds = array<i64: 4, 16, 16>}, {transform_indices = @transform_1, window_bounds = array<i64: 4, 14, 14>}]} {
    %c0 = arith.constant 0 : index
    %c0_0 = arith.constant 0 : index
    %c0_1 = arith.constant 0 : index
    %0 = vector.load %arg1[%c0, %c0_0, %c0_1] : memref<4x16x16xf32, #tpu.memory_space<vmem>>, vector<4x16x16xf32>
    %1 = vector.extract_strided_slice %0 {offsets = [0, 0, 0], sizes = [4, 14, 16], strides = [1, 1, 1]} : vector<4x16x16xf32> to vector<4x14x16xf32>
    %cst = arith.constant 0.211941555 : f32
    %2 = vector.broadcast %cst : f32 to vector<4x14x16xf32>
    %3 = arith.mulf %2, %1 : vector<4x14x16xf32>
    %4 = vector.extract_strided_slice %0 {offsets = [0, 1, 0], sizes = [4, 14, 16], strides = [1, 1, 1]} : vector<4x16x16xf32> to vector<4x14x16xf32>
    %cst_2 = arith.constant 0.57611686 : f32
    %5 = vector.broadcast %cst_2 : f32 to vector<4x14x16xf32>
    %6 = arith.mulf %5, %4 : vector<4x14x16xf32>
    %7 = arith.addf %3, %6 : vector<4x14x16xf32>
    %8 = vector.extract_strided_slice %0 {offsets = [0, 2, 0], sizes = [4, 14, 16], strides = [1, 1, 1]} : vector<4x16x16xf32> to vector<4x14x16xf32>
    %cst_3 = arith.constant 0.211941555 : f32
    %9 = vector.broadcast %cst_3 : f32 to vector<4x14x16xf32>
    %10 = arith.mulf %9, %8 : vector<4x14x16xf32>
    %11 = arith.addf %7, %10 : vector<4x14x16xf32>
    %12 = vector.extract_strided_slice %11 {offsets = [0, 0, 0], sizes = [4, 14, 14], strides = [1, 1, 1]} : vector<4x14x16xf32> to vector<4x14x14xf32>
    %cst_4 = arith.constant 0.211941555 : f32
    %13 = vector.broadcast %cst_4 : f32 to vector<4x14x14xf32>
    %14 = arith.mulf %13, %12 : vector<4x14x14xf32>
    %15 = vector.extract_strided_slice %11 {offsets = [0, 0, 1], sizes = [4, 14, 14], strides = [1, 1, 1]} : vector<4x14x16xf32> to vector<4x14x14xf32>
    %cst_5 = arith.constant 0.57611686 : f32
    %16 = vector.broadcast %cst_5 : f32 to vector<4x14x14xf32>
    %17 = arith.mulf %16, %15 : vector<4x14x14xf32>
    %18 = arith.addf %14, %17 : vector<4x14x14xf32>
    %19 = vector.extract_strided_slice %11 {offsets = [0, 0, 2], sizes = [4, 14, 14], strides = [1, 1, 1]} : vector<4x14x16xf32> to vector<4x14x14xf32>
    %cst_6 = arith.constant 0.211941555 : f32
    %20 = vector.broadcast %cst_6 : f32 to vector<4x14x14xf32>
    %21 = arith.mulf %20, %19 : vector<4x14x14xf32>
    %22 = arith.addf %18, %21 : vector<4x14x14xf32>
    %c0_7 = arith.constant 0 : index
    %c0_8 = arith.constant 0 : index
    %c0_9 = arith.constant 0 : index
    %23 = vector.load %arg2[%c0_7, %c0_8, %c0_9] : memref<4x14x14xf32, #tpu.memory_space<vmem>>, vector<4x14x14xf32>
    tpu.vector_store %arg2[%c0_7, %c0_8, %c0_9], %22 {strides = array<i32>} : memref<4x14x14xf32, #tpu.memory_space<vmem>>, vector<4x14x14xf32>,
    return
  }
  func.func @transform_0(%arg0: i32) -> (i32, i32, i32) {
    %c0_i32 = arith.constant 0 : i32
    %c0_i32_0 = arith.constant 0 : i32
    %c0_i32_1 = arith.constant 0 : i32
    return %arg0, %c0_i32, %c0_i32_0 : i32, i32, i32
  }
  func.func @transform_1(%arg0: i32) -> (i32, i32, i32) {
    %c0_i32 = arith.constant 0 : i32
    %c0_i32_0 = arith.constant 0 : i32
    %c0_i32_1 = arith.constant 0 : i32
    return %arg0, %c0_i32, %c0_i32_0 : i32, i32, i32
  }
}

</mosaic_0001>

<bundles_post_ra>
// kernel: tpu_custom_call.1
= control target key start
LH: loop header
LB: loop body
LE: loop exit
PB: predicated region body
PF: predicated region fallthrough
CT: control target
= control target key end

     0   :  { %6 = vsyncpa [#allocation3], 0  ;;  %s715_s0 = inlined_call_operand.hbm [shape: f32[8,16,16], index: 0, kind: input, shape index: {}]   ;;  %s716_s1 = inlined_call_operand.vmem [shape: f32[8,14,14], index: 1, kind: output, shape index: {}]  }
   0x1   :  { %8 = vsyncpa [#allocation3 + $0x1], 0  ;;  %s557_s6 = smov 0   ;;  %s559_s7 = smov 0  }
   0x2   :  { %s561_s8 = smov 0   ;;  %s563_s9 = smov 0  }
   0x3 LB: > { %s415_s10 = sadd.s32 4294967295, %s540_s9   ;;  %s577_s11 = sadd.s32 1, %s540_s9   ;;  %s540_s9 = sphi %s563_s9, %s723_s9   ;;  %s536_s8 = sphi %s561_s8, %s722_s8   ;;  %s532_s7 = sphi %s559_s7, %s721_s7   ;;  %s528_s6 = sphi %s557_s6, %s720_s6  }
   0x4   : > { %s18_s12 = ssub.s32 %s540_s9, %s577_s11  ;;  %s21_s13 = sadd.s32 1, %s536_s8 }
   0x5   : > { %p19_p0 = scmp.eq.s32.totalorder %s18_s12, 0  ;;  %p28_p1 = scmp.ne.s32.totalorder %s536_s8, %s532_s7 }
   0x6   : > { %p29_p2 = scmp.eq.s32.totalorder %s540_s9, 0  ;;  %p34_p3 = scmp.ne.s32.totalorder %s532_s7, %s528_s6 }
   0x7   : > { %s587_s14 = scalar_select %p19_p0, %s536_s8, %s21_s13  }
   0x8   : > { %p30_p4 = por %p29_p2, %p28_p1  ;;  %p35_p5 = scmp.eq.s32.totalorder %s415_s10, 0 }
   0x9   : > { %p439_p6 = scmp.lt.s32.totalorder %s540_s9, 2  ;;  %s84_s16 = sand.u32 1, %s536_s8  }
   0xa   : > { %p592_p7 = por %p35_p5, %p34_p3  ;;  %s419_s17 = sshll.u32 %s84_s16, 6 }
   0xb   : > { %s431_s18 = sshll.u32 %s540_s9, 10  ;;  %s88_s22 = scalar_lea.vmem [#allocation2], %s419_s17 }
   0xc   : > { %s601_s21 = scalar_lea.hbm %s715_s0, %s431_s18  ;;  %s96_s23 = sshll.u32 %s88_s22, 4  ;;  %s603_s23 = int_to_ptr.vmem [resolvable:$true] %s96_s23 }
   0xd   : > { %p605_p8 = pnand %p439_p6, %p30_p4  ;;  %s610_s25 = scalar_lea.sflag [#allocation3], %s84_s16 }
   0xe   : > { %s476_s26 = scalar_lea.hbm %s601_s21, 1024  ;;  %s481_s29 = scalar_lea.hbm %s715_s0, 2048 }
   0xf   : > { %p477_p10 = scmp.ne.s32.totalorder %s601_s21, %s476_s26  ;;  %p478_p11 = pneg %p605_p8 }
  0x10   : > { %p482_p0 = scmp.lt.u32.totalorder %s601_s21, %s715_s0  ;;  %p483_p1 = scmp.lt.u32.totalorder %s481_s29, %s476_s26 }
  0x11   : > { %p479_p12 = pnand %p478_p11, %p477_p10  ;;  %p485_p3 = scmp.lt.u32.totalorder %s476_s26, %s601_s21 }
  0x12   : > { %p484_p2 = por %p483_p1, %p482_p0 }
  0x13   : > { %p480_p13 = pneg %p479_p12 }
  0x14   : > { %p486_p4 = por %p485_p3, %p484_p2 }
  0x16   : > { %p487_p5 = pnand %p486_p4, %p480_p13 }
  0x18   : > { %490 = shalt.err (!%p487_p5)
}
  0x19   : > { %s491_s3 = scalar_lea.vmem %s603_s23, 1024  ;;  %s542_s4 = smov [#allocation2]  }
  0x1a   : > { %p492_p6 = scmp.ne.s32.totalorder %s603_s23, %s491_s3  ;;  %s496_s5 = sshll.u32 %s542_s4, 4  ;;  %s497_s5 = int_to_ptr.vmem [resolvable:$false] %s496_s5 }
  0x1b   : > { %s498_s6 = scalar_lea.vmem %s497_s5, 2048  ;;  %p499_p9 = scmp.lt.s32.totalorder %s603_s23, %s497_s5 }
  0x1c   : > { %p494_p10 = pnand %p492_p6, %p478_p11  ;;  %p500_p0 = scmp.lt.s32.totalorder %s498_s6, %s491_s3 }
  0x1e   : > { %p495_p12 = pneg %p494_p10  ;;  %p501_p1 = por %p500_p0, %p499_p9 }
  0x20   : > { %p502_p2 = pnand %p501_p1, %p495_p12 }
  0x22   : > { %505 = shalt.err (!%p502_p2)
}
  0x23   : > { %s543_s12 = smov 128   ;;  %s544_s13 = smov 8  }
  0x24   : > { %438 = dma.hbm_to_vmem [thread:$0]  (!%p605_p8), %s601_s21, 1024, %s603_s23, %s610_s25, %s543_s12, %s543_s12, %s544_s13  }
  0x25   : > { %p104_p11 = scmp.lt.s32.totalorder %s540_s9, 3  ;;  %p719_p13 = scmp.ge.s32.totalorder %s540_s9, 1 }
  0x27   : > { %p105_p3 = pnand %p719_p13, %p104_p11 }
  0x28   : > { %s110_s16 = sand.u32 (!%p105_p3), 1, %s532_s7  }
  0x29   : > { %108 = sbr.rel (%p105_p3) target bundleno = 207 (0xcf), region = 24  ;;  %s424_s17 = sshll.u32 (!%p105_p3), %s110_s16, 6 }
  0x2a   : > { %s111_s18 = scalar_lea.sflag (!%p105_p3), [#allocation3], %s110_s16  ;;  %s642_s19 = scalar_lea.vmem (!%p105_p3), [#allocation2], %s424_s17 }
  0x30   : > { %523 = dma.done.wait (%p592_p7), %s111_s18, 1024  }
  0x31   : > { %525 = vsyncadd (%p592_p7), %s111_s18, 4294966272  ;;  %v145_v0 = vld [vmem:[%s642_s19 + $0x18] sm:$0xff]  ;;  %v143_v1 = vld [vmem:[%s642_s19 + $0x8] sm:$0xff]  ;;  %vm174_vm0 = vcmask 1046528   ;;  %vm211_vm1 = vcmask 1045504   ;;  %s545_s15 = smov 127  }
  0x32   : > { %v147_v2 = vld [vmem:[%s642_s19 + $0x28] sm:$0xff]  ;;  %v651_v3 = vmul.f32 0.21194156, %v145_v0  ;;  %v653_v4 = vmul.f32 0.57611686, %v145_v0  ;;  %v142_v12 = vld [vmem:[%s642_s19] sm:$0xff] }
  0x33   : > { %v151_v5 = vmul.f32 0.21194156, %v143_v1  ;;  %v159_v6 = vmul.f32 0.57611686, %v143_v1  ;;  %v155_v7 = vmul.f32 0.21194156, %v147_v2 }
  0x34   : > { %v163_v8 = vmul.f32 0.57611686, %v147_v2  ;;  %v179_v9 = vrot.slane %v653_v4, 1  ;;  %v216_v10 = vrot.slane %v651_v3, 2  ;;  %v146_v13 = vld [vmem:[%s642_s19 + $0x20] sm:$0xff]  ;;  %v149_v18 = vld [vmem:[%s642_s19 + $0x38] sm:$0xff] }
  0x35   : > { %v213_v11 = vrot.slane %v151_v5, 2  ;;  %v176_v14 = vrot.slane %v159_v6, 1  ;;  %v219_v16 = vrot.slane %v155_v7, 2  ;;  %v150_v17 = vmul.f32 0.21194156, %v142_v12  ;;  %v144_v38 = vld [vmem:[%s642_s19 + $0x10] sm:$0xff] }
  0x36   : > { %v182_v15 = vrot.slane %v163_v8, 1  ;;  %v198_v19 = vadd.f32 %v179_v9, %v651_v3  ;;  %v158_v20 = vmul.f32 0.57611686, %v142_v12  ;;  %v154_v21 = vmul.f32 0.21194156, %v146_v13  ;;  %v148_v39 = vld [vmem:[%s642_s19 + $0x30] sm:$0xff] }
  0x37   : > { %v162_v22 = vmul.f32 0.57611686, %v146_v13  ;;  %v196_v23 = vadd.f32 %v176_v14, %v151_v5  ;;  %v212_v25 = vrot.slane %v150_v17, 2  ;;  %v157_v26 = vmul.f32 0.21194156, %v149_v18  ;;  %s546_s20 = smov 126  }
  0x38   : > { %v200_v24 = vadd.f32 %v182_v15, %v155_v7  ;;  %v235_v27 = vadd.f32 %v216_v10, %v198_v19  ;;  %v175_v28 = vrot.slane %v158_v20, 1  ;;  %v218_v30 = vrot.slane %v154_v21, 2  ;;  %s425_s21 = sshll.u32 %s415_s10, 2 }
  0x39   : > { %v181_v29 = vrot.slane %v162_v22, 1  ;;  %v233_v31 = vadd.f32 %v213_v11, %v196_v23  ;;  %v165_v33 = vmul.f32 0.57611686, %v149_v18  ;;  %v214_v36 = vsel %vm211_vm1, %v212_v25, %v213_v11  ;;  %p136_p7 = scmp.lt.s32.totalorder %s425_s21, 7 }
  0x3a   : > { %v237_v32 = vadd.f32 %v219_v16, %v200_v24  ;;  %v251_v34 = vmul.f32 0.57611686, %v235_v27  ;;  %v177_v35 = vsel %vm174_vm0, %v175_v28, %v176_v14  ;;  %v220_v43 = vsel %vm211_vm1, %v218_v30, %v219_v16 }
  0x3b   : > { %v183_v37 = vsel %vm174_vm0, %v181_v29, %v182_v15  ;;  %v249_v40 = vmul.f32 0.57611686, %v233_v31  ;;  %v195_v42 = vadd.f32 %v177_v35, %v150_v17  ;;  %v185_v45 = vrot.slane %v165_v33, 1  ;;  %s725_s21 = smov (!%p136_p7, %s425_s21), 7 }
  0x3c   : > { %v253_v41 = vmul.f32 0.57611686, %v237_v32  ;;  %270 = vrot.lane.b32.xlu1 %v251_v34, %s545_s15  ;;  %v199_v44 = vadd.f32 %v183_v37, %v154_v21  ;;  %v222_v46 = vrot.slane %v157_v26, 2  ;;  %v152_v47 = vmul.f32 0.21194156, %v144_v38  ;;  %s432_s22 = sshll.u32 %s725_s21, 4 }
  0x3d   : > { %266 = vrot.lane.b32.xlu0 %v249_v40, %s545_s15  ;;  %v232_v48 = vadd.f32 %v214_v36, %v195_v42  ;;  %v160_v49 = vmul.f32 0.57611686, %v144_v38  ;;  %v156_v50 = vmul.f32 0.21194156, %v148_v39  ;;  %v164_v51 = vmul.f32 0.57611686, %v148_v39  ;;  %s684_s25 = scalar_lea.vmem %s716_s1, %s432_s22 }
  0x3e   : > { %v236_v52 = vadd.f32 %v220_v43, %v199_v44  ;;  %v202_v53 = vadd.f32 %v185_v45, %v157_v26  ;;  %v215_v54 = vrot.slane %v152_v47, 2  ;;  %v241_v58 = vmul.f32 0.21194156, %v233_v31 }
  0x3f   : > { %v248_v55 = vmul.f32 0.57611686, %v232_v48  ;;  %v178_v56 = vrot.slane %v160_v49, 1  ;;  %v184_v57 = vrot.slane %v164_v51, 1  ;;  %v221_v60 = vrot.slane %v156_v50, 2 }
  0x40   : > { %274 = vrot.lane.b32.xlu1 %v253_v41, %s545_s15  ;;  %v239_v59 = vadd.f32 %v222_v46, %v202_v53  ;;  %v252_v61 = vmul.f32 0.57611686, %v236_v52  ;;  %v217_v63 = vsel %vm211_vm1, %v215_v54, %v216_v10  ;;  %v240_v6 = vmul.f32 0.21194156, %v232_v48 }
  0x41   : > { %264 = vrot.lane.b32.xlu0 %v248_v55, %s545_s15  ;;  %v180_v62 = vsel %vm174_vm0, %v178_v56, %v179_v9  ;;  %v186_v0 = vsel %vm174_vm0, %v184_v57, %v185_v45  ;;  %v223_v3 = vsel %vm211_vm1, %v221_v60, %v222_v46  ;;  %v243_v10 = vmul.f32 0.21194156, %v235_v27 }
  0x42   : > { %v197_v1 = vadd.f32 %v180_v62, %v152_v47  ;;  %v201_v2 = vadd.f32 %v186_v0, %v156_v50  ;;  %v255_v4 = vmul.f32 0.57611686, %v239_v59  ;;  %v245_v12 = vmul.f32 0.21194156, %v237_v32 }
  0x43   : > { %v244_v13 = vmul.f32 0.21194156, %v236_v52  ;;  %v247_v14 = vmul.f32 0.21194156, %v239_v59  ;;  %vm338_vm2 = vcmask 111616   ;;  %vm336_vm3 = vcmask 113664  }
  0x44   : > { %306 = vrot.lane.b32.xlu1 %v241_v58, %s546_s20  ;;  %v234_v5 = vadd.f32 %v217_v63, %v197_v1  ;;  %v238_v7 = vadd.f32 %v223_v3, %v201_v2 }
  0x45   : > { %272 = vrot.lane.b32.xlu0 %v252_v61, %s545_s15 }
  0x46   : > { %v250_v8 = vmul.f32 0.57611686, %v234_v5  ;;  %v254_v9 = vmul.f32 0.57611686, %v238_v7  ;;  %v242_v11 = vmul.f32 0.21194156, %v234_v5 }
  0x47   : > { %v246_v15 = vmul.f32 0.21194156, %v238_v7 }
  0x48   : > { %278 = vrot.lane.b32.xlu1 %v255_v4, %s545_s15 }
  0x49   : > { %304 = vrot.lane.b32.xlu0 %v240_v6, %s546_s20 }
  0x4c   : > { %268 = vrot.lane.b32.xlu1 %v250_v8, %s545_s15 }
  0x4d   : > { %276 = vrot.lane.b32.xlu0 %v254_v9, %s545_s15 }
  0x50   : > { %310 = vrot.lane.b32.xlu1 %v243_v10, %s546_s20 }
  0x51   : > { %308 = vrot.lane.b32.xlu0 %v242_v11, %s546_s20 }
  0x54   : > { %314 = vrot.lane.b32.xlu1 %v245_v12, %s546_s20 }
  0x55   : > { %312 = vrot.lane.b32.xlu0 %v244_v13, %s546_s20 }
  0x58   : > { %318 = vrot.lane.b32.xlu1 %v247_v14, %s546_s20 }
  0x59   : > { %316 = vrot.lane.b32.xlu0 %v246_v15, %s546_s20 }
  0xae   : > { %v271_v16 = vpop.permute.xlu1 %270 }
  0xaf   : > { %v267_v17 = vpop.permute.xlu0 %266  ;;  %v291_v30 = vadd.f32 %v271_v16, %v243_v10 }
  0xb0   : > { %v289_v20 = vadd.f32 %v267_v17, %v241_v58 }
  0xb2   : > { %v275_v18 = vpop.permute.xlu1 %274 }
  0xb3   : > { %v265_v19 = vpop.permute.xlu0 %264  ;;  %v293_v36 = vadd.f32 %v275_v18, %v245_v12 }
  0xb4   : > { %v288_v24 = vadd.f32 %v265_v19, %v240_v6 }
  0xb6   : > { %v307_v21 = vpop.permute.xlu1 %306 }
  0xb7   : > { %v329_v22 = vadd.f32 %v307_v21, %v289_v20  ;;  %v273_v23 = vpop.permute.xlu0 %272 }
  0xb8   : > { %v292_v37 = vadd.f32 %v273_v23, %v244_v13 }
  0xb9   : > { %339 = vst.msk [vmem:[%s684_s25 + $0x8] sm:$0x3f] %vm338_vm2, %v329_v22 }
  0xba   : > { %v279_v25 = vpop.permute.xlu1 %278 }
  0xbb   : > { %v305_v26 = vpop.permute.xlu0 %304  ;;  %v295_v42 = vadd.f32 %v279_v25, %v247_v14 }
  0xbc   : > { %v328_v27 = vadd.f32 %v305_v26, %v288_v24 }
  0xbe   : > { %337 = vst.msk [vmem:[%s684_s25] sm:$0xff] %vm336_vm3, %v328_v27  ;;  %v269_v28 = vpop.permute.xlu1 %268 }
  0xbf   : > { %v277_v29 = vpop.permute.xlu0 %276  ;;  %v290_v31 = vadd.f32 %v269_v28, %v242_v11 }
  0xc0   : > { %v294_v43 = vadd.f32 %v277_v29, %v246_v15 }
  0xc2   : > { %v311_v32 = vpop.permute.xlu1 %310 }
  0xc3   : > { %v331_v33 = vadd.f32 %v311_v32, %v291_v30  ;;  %v309_v34 = vpop.permute.xlu0 %308 }
  0xc4   : > { %v330_v35 = vadd.f32 %v309_v34, %v290_v31 }
  0xc5   : > { %341 = vst.msk [vmem:[%s684_s25 + $0x18] sm:$0x3f] %vm338_vm2, %v331_v33 }
  0xc6   : > { %340 = vst.msk [vmem:[%s684_s25 + $0x10] sm:$0xff] %vm336_vm3, %v330_v35  ;;  %v315_v38 = vpop.permute.xlu1 %314 }
  0xc7   : > { %v333_v39 = vadd.f32 %v315_v38, %v293_v36  ;;  %v313_v40 = vpop.permute.xlu0 %312 }
  0xc8   : > { %v332_v41 = vadd.f32 %v313_v40, %v292_v37 }
  0xc9   : > { %343 = vst.msk [vmem:[%s684_s25 + $0x28] sm:$0x3f] %vm338_vm2, %v333_v39 }
  0xca   : > { %342 = vst.msk [vmem:[%s684_s25 + $0x20] sm:$0xff] %vm336_vm3, %v332_v41  ;;  %v319_v44 = vpop.permute.xlu1 %318 }
  0xcb   : > { %v335_v45 = vadd.f32 %v319_v44, %v295_v42  ;;  %v317_v46 = vpop.permute.xlu0 %316 }
  0xcc   : > { %v334_v47 = vadd.f32 %v317_v46, %v294_v43 }
  0xcd   : > { %345 = vst.msk [vmem:[%s684_s25 + $0x38] sm:$0x3f] %vm338_vm2, %v335_v45 }
  0xce   : > { %344 = vst.msk [vmem:[%s684_s25 + $0x30] sm:$0xff] %vm336_vm3, %v334_v47 }
  0xcf PF: > { %p11_p8 = scmp.ge.s32.totalorder %s577_s11, 4   ;;  %s720_s6 = smov %s532_s7 }
  0xd0   : > { %s721_s7 = smov %s536_s8  ;;  %s722_s8 = smov %s587_s14 }
  0xd1   : > { %s723_s9 = smov %s577_s11  ;;  %13 = sbr.rel (!%p11_p8) target bundleno = 3 (0x3), region = 64 }
  0xd8   :  { %370 = vsyncpa [#allocation3], 1 }
  0xd9   :  { %372 = vsyncpa [#allocation3 + $0x1], 1 }

</bundles_post_ra>
